<compile_context>
chip_gen: v7x
topology: tpu7x:2x2x1
jax: 0.10.0
libtpu: 0.0.40
codegen_flags: <defaults>
</compile_context>

<pallas_src>
import functools

import jax
import jax.numpy as jnp
from jax.experimental import pallas as pl
from jax.experimental.pallas import tpu as pltpu


# ---------------------------------------------------------------------------
# Kernels
# ---------------------------------------------------------------------------

def _stats(x, inv_h, eps):
    # Single pass: sum and sum-of-squares are independent reductions, so the
    # second XLU reduction does not wait on a centered intermediate.
    s1 = jnp.sum(x, axis=-1, keepdims=True)
    s2 = jnp.sum(x * x, axis=-1, keepdims=True)
    mean = s1 * inv_h
    # Guard against tiny negative values from E[x^2] - mean^2 cancellation.
    var = jnp.maximum(s2 * inv_h - mean * mean, 0.0) + eps
    return mean, var


def _adanorm_kernel(x_ref, w_ref, o_ref, *, k, eps, inv_h):
    # x_ref: (TR, H) tile of rows; w_ref: (1, H) weight; o_ref: (TR, H)
    x = x_ref[...].astype(jnp.float32)
    mean, var = _stats(x, inv_h, eps)
    norm = (x - mean) * jax.lax.rsqrt(var)
    w = w_ref[...].astype(jnp.float32)            # (1, H) broadcast over rows
    o_ref[...] = (w * (1.0 - k * norm) * norm).astype(o_ref.dtype)


def _adanorm_bias_kernel(x_ref, w_ref, b_ref, o_ref, *, k, eps, inv_h):
    x = x_ref[...].astype(jnp.float32)
    mean, var = _stats(x, inv_h, eps)
    norm = (x - mean) * jax.lax.rsqrt(var)
    w = w_ref[...].astype(jnp.float32)
    b = b_ref[...].astype(jnp.float32)
    o_ref[...] = (w * (1.0 - k * norm) * norm + b).astype(o_ref.dtype)


# ---------------------------------------------------------------------------
# Wrapper
# ---------------------------------------------------------------------------

_X_TILE_BYTES_TARGET = 4 * 1024 * 1024   # per x tile; ~16 MiB total pipelined


def _round_up(v, m):
    return ((v + m - 1) // m) * m


def _pick_row_tile(rows, H, dtype_bytes):
    """Largest sublane-aligned row tile that fits the VMEM pipeline budget."""
    # Sub-32-bit dtypes pack rows along sublanes: bf16 -> 16, int8 -> 32.
    sublane = 16 if dtype_bytes == 2 else (32 if dtype_bytes == 1 else 8)

    tr = _X_TILE_BYTES_TARGET // max(1, H * dtype_bytes)
    tr = max(sublane, (tr // sublane) * sublane)
    tr = min(tr, 4096)

    # Keep at least 2 grid steps when there is enough work so the parallel
    # grid axis can be sharded across v7x's two TensorCores.
    if rows >= 2 * sublane:
        half = max(sublane, ((rows // 2) // sublane) * sublane)
        tr = min(tr, half)

    # Never pad beyond one sublane-aligned tile for tiny inputs.
    tr = min(tr, _round_up(rows, sublane))
    return tr


def adanorm(x, weight, bias=None, *, k: float = 0.1, eps: float = 1e-5):
    """AdaNorm over the last axis of `x`.

    x:      (..., H)
    weight: (H,)
    bias:   (H,) or None
    """
    orig_shape = x.shape
    H = orig_shape[-1]
    rows = 1
    for d in orig_shape[:-1]:
        rows *= d
    x2 = x.reshape(rows, H)

    dtype_bytes = jnp.dtype(x.dtype).itemsize
    tr = _pick_row_tile(rows, H, dtype_bytes)

    # Pad ragged row counts up to a tile multiple (zero rows: mean=0, var=eps
    # -> finite; padded outputs are sliced off below).
    rows_p = _round_up(rows, tr)
    if rows_p != rows:
        x2 = jnp.pad(x2, ((0, rows_p - rows), (0, 0)))

    grid = (rows_p // tr,)
    w2 = weight.reshape(1, H)

    # TODO(synk): for H < 128 the output store is lane-masked (vst.msk); for
    # production shapes prefer H % 128 == 0 or a lane-packed layout.
    in_specs = [
        pl.BlockSpec((tr, H), lambda i: (i, 0)),     # x tile: rows advance with grid
        pl.BlockSpec((1, H), lambda i: (0, 0)),      # weight: same block every step
    ]
    args = (x2, w2)
    if bias is not None:
        b2 = bias.reshape(1, H)
        in_specs.append(pl.BlockSpec((1, H), lambda i: (0, 0)))
        args = (x2, w2, b2)
        kernel = functools.partial(_adanorm_bias_kernel,
                                   k=float(k), eps=float(eps), inv_h=1.0 / H)
        param_bytes = 2 * H * jnp.dtype(weight.dtype).itemsize
    else:
        kernel = functools.partial(_adanorm_kernel,
                                   k=float(k), eps=float(eps), inv_h=1.0 / H)
        param_bytes = H * jnp.dtype(weight.dtype).itemsize

    # 2 double-buffered x tiles + 2 double-buffered out tiles (+ headroom).
    tile_bytes = tr * H * dtype_bytes
    vmem_limit = int(min(64 * 1024 * 1024,
                         max(32 * 1024 * 1024, 4 * tile_bytes + (2 << 20))))

    cost = pl.CostEstimate(
        flops=8 * rows_p * H,
        transcendentals=rows_p,                       # one rsqrt per row
        bytes_accessed=2 * rows_p * H * dtype_bytes + param_bytes,
    )

    out = pl.pallas_call(
        kernel,
        out_shape=jax.ShapeDtypeStruct((rows_p, H), x.dtype),
        grid_spec=pltpu.PrefetchScalarGridSpec(
            num_scalar_prefetch=0,
            grid=grid,
            in_specs=in_specs,
            out_specs=pl.BlockSpec((tr, H), lambda i: (i, 0)),
        ),
        compiler_params=pltpu.CompilerParams(
            dimension_semantics=("parallel",),
            vmem_limit_bytes=vmem_limit,
        ),
        cost_estimate=cost,
    )(*args)

    if rows_p != rows:
        out = out[:rows]
    return out.reshape(orig_shape)


# TODO(synk): the original AdaNorm detaches the (1 - k*norm) factor in the
# backward pass; if gradients are needed, wrap this in jax.custom_vjp that
# reproduces the stop_gradient. Forward semantics are identical.


def adanorm_ref(x, weight, bias=None, *, k: float = 0.1, eps: float = 1e-5):
    """Pure-JAX reference mirroring the PyTorch forward."""
    x32 = x.astype(jnp.float32)
    mean = jnp.mean(x32, axis=-1, keepdims=True)
    var = jnp.mean((x32 - mean) ** 2, axis=-1, keepdims=True) + eps
    norm = (x32 - mean) * jax.lax.rsqrt(var)
    out = weight.astype(jnp.float32) * (1.0 - k * norm) * norm
    if bias is not None:
        out = out + bias.astype(jnp.float32)
    return out.astype(x.dtype)


if __name__ == "__main__":
    key = jax.random.PRNGKey(0)
    kx, kb = jax.random.split(key)

    batch, seq, hidden = 2, 8, 32
    x = jax.random.normal(kx, (batch, seq, hidden), dtype=jnp.float32)

    # Parameters per AdaNorm.reset_parameters(): weight = ones (bias=False default).
    weight = jnp.ones((hidden,), dtype=jnp.float32)

    out = adanorm(x, weight, bias=None, k=0.1, eps=1e-5)
    out = jax.block_until_ready(out)
    ref = adanorm_ref(x, weight, bias=None, k=0.1, eps=1e-5)
    assert out.shape == x.shape and out.dtype == x.dtype
    assert jnp.allclose(out, ref, atol=1e-5, rtol=1e-5), "mismatch vs reference (no bias)"

    # Also exercise the bias=True path.
    bias = jax.random.normal(kb, (hidden,), dtype=jnp.float32)
    out_b = adanorm(x, weight, bias=bias, k=0.1, eps=1e-5)
    out_b = jax.block_until_ready(out_b)
    ref_b = adanorm_ref(x, weight, bias=bias, k=0.1, eps=1e-5)
    assert jnp.allclose(out_b, ref_b, atol=1e-5, rtol=1e-5), "mismatch vs reference (bias)"

    print("KERNEL_OK")
</pallas_src>

<mosaic_0001>
module attributes {stable_mosaic.version = 11 : i64} {
  func.func @_adanorm_kernel(%arg0: i32, %arg1: memref<8x32xf32, #tpu.memory_space<vmem>>, %arg2: memref<1x32xf32, #tpu.memory_space<vmem>>, %arg3: memref<8x32xf32, #tpu.memory_space<vmem>>) attributes {dimension_semantics = [#tpu.dimension_semantics<parallel>], iteration_bounds = array<i64: 2>, scalar_prefetch = 0 : i64, scratch_operands = 0 : i64, tpu.core_type = #tpu.core_type<tc>, window_params = [{transform_indices = @transform_0, window_bounds = array<i64: 8, 32>}, {pipeline_mode = #tpu.pipeline_mode<synchronous>, transform_indices = @transform_1, window_bounds = array<i64: 1, 32>}, {transform_indices = @transform_2, window_bounds = array<i64: 8, 32>}]} {
    %c0 = arith.constant 0 : index
    %c0_0 = arith.constant 0 : index
    %0 = vector.load %arg1[%c0, %c0_0] : memref<8x32xf32, #tpu.memory_space<vmem>>, vector<8x32xf32>
    %cst = arith.constant dense<0.000000e+00> : vector<8xf32>
    %1 = vector.multi_reduction <add>, %0, %cst [1] : vector<8x32xf32> to vector<8xf32>
    %2 = vector.shape_cast %1 : vector<8xf32> to vector<8x1xf32>
    %3 = arith.mulf %0, %0 : vector<8x32xf32>
    %cst_1 = arith.constant dense<0.000000e+00> : vector<8xf32>
    %4 = vector.multi_reduction <add>, %3, %cst_1 [1] : vector<8x32xf32> to vector<8xf32>
    %5 = vector.shape_cast %4 : vector<8xf32> to vector<8x1xf32>
    %cst_2 = arith.constant 3.125000e-02 : f32
    %6 = vector.broadcast %cst_2 : f32 to vector<8x1xf32>
    %7 = arith.mulf %2, %6 : vector<8x1xf32>
    %cst_3 = arith.constant 3.125000e-02 : f32
    %8 = vector.broadcast %cst_3 : f32 to vector<8x1xf32>
    %9 = arith.mulf %5, %8 : vector<8x1xf32>
    %10 = arith.mulf %7, %7 : vector<8x1xf32>
    %11 = arith.subf %9, %10 : vector<8x1xf32>
    %cst_4 = arith.constant 0.000000e+00 : f32
    %12 = vector.broadcast %cst_4 : f32 to vector<8x1xf32>
    %13 = arith.maximumf %11, %12 : vector<8x1xf32>
    %cst_5 = arith.constant 9.99999974E-6 : f32
    %14 = vector.broadcast %cst_5 : f32 to vector<8x1xf32>
    %15 = arith.addf %13, %14 : vector<8x1xf32>
    %16 = vector.broadcast %7 : vector<8x1xf32> to vector<8x32xf32>
    %17 = arith.subf %0, %16 : vector<8x32xf32>
    %18 = math.rsqrt %15 : vector<8x1xf32>
    %19 = vector.broadcast %18 : vector<8x1xf32> to vector<8x32xf32>
    %20 = arith.mulf %17, %19 : vector<8x32xf32>
    %c0_6 = arith.constant 0 : index
    %c0_7 = arith.constant 0 : index
    %21 = vector.load %arg2[%c0_6, %c0_7] : memref<1x32xf32, #tpu.memory_space<vmem>>, vector<1x32xf32>
    %cst_8 = arith.constant 1.000000e-01 : f32
    %22 = vector.broadcast %cst_8 : f32 to vector<8x32xf32>
    %23 = arith.mulf %22, %20 : vector<8x32xf32>
    %cst_9 = arith.constant 1.000000e+00 : f32
    %24 = vector.broadcast %cst_9 : f32 to vector<8x32xf32>
    %25 = arith.subf %24, %23 : vector<8x32xf32>
    %26 = vector.broadcast %21 : vector<1x32xf32> to vector<8x32xf32>
    %27 = arith.mulf %26, %25 : vector<8x32xf32>
    %28 = arith.mulf %27, %20 : vector<8x32xf32>
    %c0_10 = arith.constant 0 : index
    %c0_11 = arith.constant 0 : index
    %29 = vector.load %arg3[%c0_10, %c0_11] : memref<8x32xf32, #tpu.memory_space<vmem>>, vector<8x32xf32>
    tpu.vector_store %arg3[%c0_10, %c0_11], %28 {strides = array<i32>} : memref<8x32xf32, #tpu.memory_space<vmem>>, vector<8x32xf32>,
    return
  }
  func.func @transform_0(%arg0: i32) -> (i32, i32) {
    %c0_i32 = arith.constant 0 : i32
    %c0_i32_0 = arith.constant 0 : i32
    return %arg0, %c0_i32 : i32, i32
  }
  func.func @transform_1(%arg0: i32) -> (i32, i32) {
    %c0_i32 = arith.constant 0 : i32
    %c0_i32_0 = arith.constant 0 : i32
    %c0_i32_1 = arith.constant 0 : i32
    return %c0_i32, %c0_i32_0 : i32, i32
  }
  func.func @transform_2(%arg0: i32) -> (i32, i32) {
    %c0_i32 = arith.constant 0 : i32
    %c0_i32_0 = arith.constant 0 : i32
    return %arg0, %c0_i32 : i32, i32
  }
}

</mosaic_0001>

<bundles_post_ra>
// kernel: tpu_custom_call.1
= control target key start
LH: loop header
LB: loop body
LE: loop exit
PB: predicated region body
PF: predicated region fallthrough
CT: control target
= control target key end

     0   :  { %7 = vsyncpa [#allocation3], 0  ;;  %s616_s0 = inlined_call_operand.hbm [shape: f32[16,32], index: 0, kind: input, shape index: {}]   ;;  %s617_s1 = inlined_call_operand.vmem [shape: f32[1,32], index: 1, kind: input, shape index: {}]   ;;  %s618_s2 = inlined_call_operand.hbm [shape: f32[16,32], index: 2, kind: output, shape index: {}]  }
   0x1   :  { %9 = vsyncpa [#allocation3 + $0x1], 0 }
   0x2   :  { %10 = vsyncpa [#allocation4], 0 }
   0x3   :  { %12 = vsyncpa [#allocation4 + $0x1], 0  ;;  %s449_s9 = smov 0   ;;  %s451_s10 = smov 0  }
   0x4   :  { %s453_s11 = smov 0   ;;  %s455_s12 = smov 0  }
   0x5 LB: > { %s470_s13 = sadd.s32 4294967295, %s430_s12   ;;  %s273_s14 = sadd.s32 4294967294, %s430_s12   ;;  %s430_s12 = sphi %s455_s12, %s633_s12   ;;  %s426_s11 = sphi %s453_s11, %s632_s11   ;;  %s422_s10 = sphi %s451_s10, %s631_s10   ;;  %s418_s9 = sphi %s449_s9, %s630_s9  }
   0x6   : > { %s474_s15 = sadd.s32 1, %s430_s12   ;;  %s25_s16 = sadd.s32 1, %s426_s11 }
   0x7   : > { %s22_s17 = ssub.s32 %s430_s12, %s474_s15  ;;  %p32_p0 = scmp.ne.s32.totalorder %s426_s11, %s422_s10 }
   0x8   : > { %p23_p1 = scmp.eq.s32.totalorder %s22_s17, 0  ;;  %p33_p2 = scmp.eq.s32.totalorder %s430_s12, 0 }
   0x9   : > { %p38_p3 = scmp.ne.s32.totalorder %s422_s10, %s418_s9  ;;  %p39_p4 = scmp.eq.s32.totalorder %s470_s13, 0 }
   0xa   : > { %s486_s18 = scalar_select %p23_p1, %s426_s11, %s25_s16  }
   0xb   : > { %p488_p5 = por %p33_p2, %p32_p0  ;;  %p492_p6 = por %p39_p4, %p38_p3 }
   0xc   : > { %p83_p7 = scmp.eq.s32.totalorder %s470_s13, 1  ;;  %p89_p8 = scmp.eq.s32.totalorder %s273_s14, 1 }
   0xd   : > { %p298_p10 = scmp.lt.s32.totalorder %s430_s12, 2  ;;  %s112_s23 = sand.u32 1, %s426_s11  }
   0xe   : > { %p499_p11 = por %p83_p7, %p32_p0  ;;  %p503_p12 = por %p89_p8, %p38_p3 }
   0xf   : > { %s277_s24 = sshll.u32 %s430_s12, 7  ;;  %s276_s25 = sshll.u32 %s112_s23, 3 }
  0x10   : > { %s622_s21 = scalar_select %p499_p11, 1, 0 }
  0x11   : > { %s623_s22 = scalar_select %p503_p12, 1, 0 }
  0x12   : > { %s512_s28 = scalar_lea.hbm %s616_s0, %s277_s24  ;;  %s116_s29 = scalar_lea.vmem [#allocation2], %s276_s25 }
  0x13   : > { %s123_s30 = sshll.u32 %s116_s29, 4  ;;  %p516_p13 = pnand %p298_p10, %p488_p5  ;;  %s520_s30 = int_to_ptr.vmem [resolvable:$true] %s123_s30 }
  0x14   : > { %s113_s4 = scalar_lea.sflag [#allocation3], %s112_s23  ;;  %s334_s5 = scalar_lea.hbm %s512_s28, 128 }
  0x15   : > { %p335_p2 = scmp.ne.s32.totalorder %s512_s28, %s334_s5  ;;  %p336_p3 = pneg %p516_p13 }
  0x16   : > { %s339_s8 = scalar_lea.hbm %s616_s0, 256  ;;  %p340_p5 = scmp.lt.u32.totalorder %s512_s28, %s616_s0 }
  0x17   : > { %p337_p4 = pnand %p336_p3, %p335_p2  ;;  %p341_p8 = scmp.lt.u32.totalorder %s339_s8, %s334_s5 }
  0x18   : > { %p343_p9 = scmp.lt.u32.totalorder %s334_s5, %s512_s28 }
  0x19   : > { %p338_p7 = pneg %p337_p4  ;;  %p342_p10 = por %p341_p8, %p340_p5 }
  0x1b   : > { %p344_p0 = por %p343_p9, %p342_p10 }
  0x1d   : > { %p345_p1 = pnand %p344_p0, %p338_p7 }
  0x1f   : > { %348 = shalt.err (!%p345_p1)
}
  0x20   : > { %s349_s17 = scalar_lea.vmem %s520_s30, 128  ;;  %s432_s19 = smov [#allocation2]  }
  0x21   : > { %p350_p2 = scmp.ne.s32.totalorder %s520_s30, %s349_s17  ;;  %s354_s23 = sshll.u32 %s432_s19, 4  ;;  %s355_s23 = int_to_ptr.vmem [resolvable:$false] %s354_s23 }
  0x22   : > { %s356_s24 = scalar_lea.vmem %s355_s23, 256  ;;  %p357_p11 = scmp.lt.s32.totalorder %s520_s30, %s355_s23 }
  0x23   : > { %p352_p4 = pnand %p350_p2, %p336_p3  ;;  %p358_p5 = scmp.lt.s32.totalorder %s356_s24, %s349_s17 }
  0x25   : > { %p353_p12 = pneg %p352_p4  ;;  %p359_p8 = por %p358_p5, %p357_p11 }
  0x27   : > { %p360_p9 = pnand %p359_p8, %p353_p12 }
  0x29   : > { %363 = shalt.err (!%p360_p9)
}
  0x2a   : > { %293 = dma.hbm_to_vmem [thread:$0]  (!%p516_p13), %s512_s28, 128, %s520_s30, %s113_s4  }
  0x2b   : > { %p625_p0 = scmp.lt.s32.totalorder %s430_s12, 3  ;;  %p626_p1 = scmp.ge.s32.totalorder %s430_s12, 1 }
  0x2d   : > { %p129_p3 = pnand %p626_p1, %p625_p0 }
  0x2e   : > { %s554_s25 = sand.u32 (!%p129_p3), 1, %s422_s10  }
  0x2f   : > { %132 = sbr.rel (%p129_p3) target bundleno = 246 (0xf6), region = 28  ;;  %s279_s26 = sshll.u32 (!%p129_p3), %s554_s25, 3 }
  0x30   : > { %s135_s27 = scalar_lea.sflag (!%p129_p3), [#allocation3], %s554_s25  ;;  %s138_s29 = scalar_lea.vmem (!%p129_p3), [#allocation2], %s279_s26 }
  0x36   : > { %409 = dma.done.wait (%p492_p6), %s135_s27, 128  }
  0x37   : > { %411 = vsyncadd (%p492_p6), %s135_s27, 4294967168  ;;  %vm160_vm0 = vcmask 261120   ;;  %v159_v0 = vld [vmem:[%s138_s29] sm:$0xff]  ;;  %s283_s30 = sshll.u32 %s470_s13, 7  ;;  %s158_s3 = scalar_lea.vmem [#allocation5], %s279_s26 }
  0x38   : > { %v161_v1 = vsel %vm160_vm0, %v159_v0, 0.0  ;;  %v164_v2 = vmul.f32 %v159_v0, %v159_v0  ;;  %v281_v16 = vld [vmem:[%s617_s1] ss:$0 sm:$0xff]  ;;  %s203_s4 = sshll.u32 %s158_s3, 4  ;;  %s571_s7 = scalar_lea.hbm %s618_s2, %s283_s30  ;;  %s573_s4 = int_to_ptr.vmem [resolvable:$true] %s203_s4 }
  0x39   : > { %162 = vadd.xlane.f32.xlu0 %v161_v1  ;;  %s190_s8 = scalar_lea.sflag [#allocation4], %s554_s25  ;;  %s364_s14 = scalar_lea.vmem %s573_s4, 128 }
  0x3a   : > { %v165_v3 = vsel %vm160_vm0, %v164_v2, 0.0  ;;  %p365_p6 = scmp.ne.s32.totalorder %s573_s4, %s364_s14  ;;  %p627_p11 = scmp.ne.s32.totalorder %s622_s21, 0 }
  0x3b   : > { %s433_s13 = smov [#allocation5]  }
  0x3c   : > { %p366_p12 = pnand %p365_p6, %p627_p11  ;;  %s368_s16 = sshll.u32 %s433_s13, 4  ;;  %s369_s16 = int_to_ptr.vmem [resolvable:$false] %s368_s16 }
  0x3d   : > { %166 = vadd.xlane.f32.xlu0 %v165_v3  ;;  %s370_s17 = scalar_lea.vmem %s369_s16, 256  ;;  %p371_p7 = scmp.lt.s32.totalorder %s573_s4, %s369_s16 }
  0x3e   : > { %p367_p13 = pneg %p366_p12  ;;  %p372_p10 = scmp.lt.s32.totalorder %s370_s17, %s364_s14 }
  0x40   : > { %p373_p2 = por %p372_p10, %p371_p7 }
  0x42   : > { %p374_p4 = pnand %p373_p2, %p367_p13 }
  0xc6   : > { %v163_v4 = vpop.xlane.xlu0 %162 }
  0xc7   : > { %v168_v5 = vmul.f32 0.03125, %v163_v4 }
  0xc9   : > { %v170_v7 = vmul.f32 %v168_v5, %v168_v5  ;;  %v174_v12 = vsub.f32 %v159_v0, %v168_v5 }
  0xca   : > { %v167_v6 = vpop.xlane.xlu0 %166 }
  0xcb   : > { %v169_v8 = vmul.f32 0.03125, %v167_v6 }
  0xcd   : > { %v171_v9 = vsub.f32 %v169_v8, %v170_v7 }
  0xcf   : > { %v172_v10 = vmax.f32 %v171_v9, 0.0 }
  0xd1   : > { %v173_v11 = vadd.f32 1e-05, %v172_v10 }
  0xd3   : > { %332 = vrsqrt.f32 %v173_v11 }
  0xdd   : > { %v333_v13 = vpop.eup %332 }
  0xde   : > { %v176_v14 = vmul.f32 %v333_v13, %v174_v12 }
  0xe0   : > { %v178_v15 = vmul.f32 0.1, %v176_v14 }
  0xe2   : > { %v179_v17 = vsub.f32 1.0, %v178_v15 }
  0xe4   : > { %v186_v18 = vmul.f32 %v281_v16, %v179_v17 }
  0xe6   : > { %v187_v19 = vmul.f32 %v186_v18, %v176_v14 }
  0xe8   : > { %188 = vst.msk [vmem:[%s158_s3] sm:$0xff] %vm160_vm0, %v187_v19 }
  0xe9   : > { %377 = shalt.err (!%p374_p4)
}
  0xea   : > { %s378_s19 = scalar_lea.hbm %s571_s7, 128  ;;  %s382_s25 = scalar_lea.hbm %s618_s2, 256 }
  0xeb   : > { %p379_p5 = scmp.ne.s32.totalorder %s571_s7, %s378_s19  ;;  %p383_p0 = scmp.lt.u32.totalorder %s571_s7, %s618_s2 }
  0xec   : > { %p384_p1 = scmp.lt.u32.totalorder %s382_s25, %s378_s19  ;;  %p386_p6 = scmp.lt.u32.totalorder %s378_s19, %s571_s7 }
  0xed   : > { %p380_p8 = pnand %p379_p5, %p627_p11 }
  0xee   : > { %p385_p3 = por %p384_p1, %p383_p0 }
  0xef   : > { %p381_p9 = pneg %p380_p8 }
  0xf0   : > { %p387_p12 = por %p386_p6, %p385_p3 }
  0xf2   : > { %p388_p13 = pnand %p387_p12, %p381_p9 }
  0xf4   : > { %391 = shalt.err (!%p388_p13)
}
  0xf5   : > { %288 = dma.vmem_to_hbm [thread:$0]  (%p627_p11), %s573_s4, 128, %s571_s7, %s190_s8  }
  0xf6 PF: > { %s215_s29 = sand.u32 1, %s418_s9   ;;  %p628_p7 = scmp.ne.s32.totalorder %s623_s22, 0 }
  0xf7   : > { %p629_p10 = scmp.ge.s32.totalorder %s430_s12, 2  ;;  %s216_s20 = scalar_lea.sflag [#allocation4], %s215_s29 }
  0xf9   : > { %p295_p2 = pnand %p629_p10, %p628_p7 }
  0xfb   : > { %413 = dma.done.wait (!%p295_p2), %s216_s20, 128  }
  0xfc   : > { %415 = vsyncadd (!%p295_p2), %s216_s20, 4294967168  ;;  %p15_p4 = scmp.ge.s32.totalorder %s474_s15, 4   ;;  %s630_s9 = smov %s422_s10 }
  0xfd   : > { %s631_s10 = smov %s426_s11  ;;  %s632_s11 = smov %s486_s18 }
  0xfe   : > { %s633_s12 = smov %s474_s15  ;;  %17 = sbr.rel (!%p15_p4) target bundleno = 5 (0x5), region = 73 }
 0x105   :  { %221 = vsyncpa [#allocation3], 1 }
 0x106   :  { %223 = vsyncpa [#allocation3 + $0x1], 1 }
 0x107   :  { %224 = vsyncpa [#allocation4], 1 }
 0x108   :  { %226 = vsyncpa [#allocation4 + $0x1], 1 }

</bundles_post_ra>
